<compile_context>
chip_gen: v6e
topology: v6e:2x2x1
jax: 0.10.0
libtpu: 0.0.40
codegen_flags: <defaults>
</compile_context>

<pallas_src>
import jax
import jax.numpy as jnp
from jax.experimental import pallas as pl
from jax.experimental.pallas import tpu as pltpu


def _chomp_copy_kernel(x_ref, o_ref):
    # Whole-tile copy: the input BlockSpec already selects exactly the prefix
    # region that belongs in the output tile.
    o_ref[...] = x_ref[...]


def _round_up(v: int, m: int) -> int:
    return ((v + m - 1) // m) * m


def chomp1d(x: jax.Array, chomp_size: int) -> jax.Array:
    """Pallas implementation of Chomp1d.forward: x[:, :, :-chomp_size]."""
    # chomp_size == 0 is intentionally rejected: PyTorch's x[:, :, :-0] would
    # return an empty tensor, which is never what TCN padding removal wants.
    assert chomp_size > 0, "chomp_size must be positive (matches TCN usage)"
    n, c, l = x.shape
    l_out = l - chomp_size
    assert l_out > 0, "chomp_size must be smaller than the sequence length"

    rows = n * c
    x2 = x.reshape(rows, l)  # zero-copy: chomp only truncates the last axis

    itemsize = jnp.dtype(x.dtype).itemsize
    # Dtype-aware sublane packing: 8 rows/vreg-tile for 4-byte, 16 for 2-byte
    # (bf16), 32 for 1-byte (int8 / fp8) elements.
    sublane = max(8, 32 // itemsize)

    # Per-buffer VMEM budget.  4 buffers live at once (in + out, each
    # double-buffered), so 4 MiB/buffer => <= 16 MiB total: safe on every
    # generation (well under v7x's 64 MiB physical VMEM) while giving long,
    # contiguous per-row HBM bursts.
    per_buffer_budget = 4 * 1024 * 1024

    # --- Lane tile: prefer the full (128-rounded) row when it fits. ---------
    tl_full = _round_up(l_out, 128)
    max_tl_at_min_rows = max(
        128, (per_buffer_budget // (sublane * itemsize)) // 128 * 128
    )
    if tl_full <= max_tl_at_min_rows:
        tl = tl_full                      # full-row tile: 1 lane block per row
    else:
        tl = min(2048, max_tl_at_min_rows)  # very long sequences: 2048-wide tiles

    # --- Row tile: as big as the budget allows, sublane-aligned. ------------
    max_tr = per_buffer_budget // (tl * itemsize)
    max_tr = max(sublane, (max_tr // sublane) * sublane)
    tr = min(512, _round_up(rows, sublane), max_tr)
    # v7x megacore: keep at least 2 row blocks when the row count allows it so
    # both TensorCores get work (no effect on correctness for v5e/v6e).
    if rows > sublane:
        tr = min(tr, _round_up(pl.cdiv(rows, 2), sublane))

    grid = (pl.cdiv(rows, tr), pl.cdiv(l_out, tl))

    cost = pl.CostEstimate(
        flops=0,
        transcendentals=0,
        bytes_accessed=2 * rows * l_out * itemsize,  # read prefix + write out
    )

    out2 = pl.pallas_call(
        _chomp_copy_kernel,
        out_shape=jax.ShapeDtypeStruct((rows, l_out), x.dtype),
        grid_spec=pltpu.PrefetchScalarGridSpec(
            num_scalar_prefetch=0,
            grid=grid,
            # Input is indexed by the SAME (row-block, lout-block) indices as
            # the output, so only the kept prefix of x is read from HBM (the
            # final partial lane tile may touch a few masked tail columns).
            in_specs=[pl.BlockSpec((tr, tl), lambda ri, li: (ri, li))],
            out_specs=pl.BlockSpec((tr, tl), lambda ri, li: (ri, li)),
        ),
        compiler_params=pltpu.CompilerParams(
            dimension_semantics=("parallel", "parallel"),
            # Raise above v5e's 16 MiB scoped default; 32 MiB is within every
            # generation's physical VMEM (64 MiB on v7x, 128 MiB on v5e/v6e).
            vmem_limit_bytes=32 * 1024 * 1024,
        ),
        cost_estimate=cost,
    )(x2)

    return out2.reshape(n, c, l_out)


if __name__ == "__main__":
    key = jax.random.PRNGKey(0)

    # Small shape consistent with TCN usage: (batch=2, channels=4, length=16).
    chomp_size = 3
    x = jax.random.normal(key, (2, 4, 16), dtype=jnp.float32)
    out = jax.block_until_ready(chomp1d(x, chomp_size))
    ref = x[:, :, :-chomp_size]
    assert out.shape == ref.shape == (2, 4, 16 - chomp_size)
    assert out.dtype == x.dtype
    assert jnp.array_equal(out, ref)

    # Exercise full-row lane tiles, multiple row blocks and partial row edges.
    key2 = jax.random.PRNGKey(1)
    x2 = jax.random.normal(key2, (2, 16, 1200), dtype=jnp.float32)
    out2 = jax.block_until_ready(chomp1d(x2, 5))
    ref2 = x2[:, :, :-5]
    assert out2.shape == ref2.shape
    assert jnp.array_equal(out2, ref2)

    # bf16 path: checks dtype-aware sublane rounding (16 rows per packed tile).
    key3 = jax.random.PRNGKey(2)
    x3 = jax.random.normal(key3, (3, 7, 260), dtype=jnp.bfloat16)
    out3 = jax.block_until_ready(chomp1d(x3, 4))
    ref3 = x3[:, :, :-4]
    assert out3.shape == ref3.shape
    assert out3.dtype == x3.dtype
    assert jnp.array_equal(out3, ref3)

    print("KERNEL_OK")
</pallas_src>

<mosaic_0001>
module attributes {stable_mosaic.version = 11 : i64} {
  func.func @_chomp_copy_kernel(%arg0: i32, %arg1: i32, %arg2: memref<8x128xf32, #tpu.memory_space<vmem>>, %arg3: memref<8x128xf32, #tpu.memory_space<vmem>>) attributes {dimension_semantics = [#tpu.dimension_semantics<parallel>, #tpu.dimension_semantics<parallel>], iteration_bounds = array<i64: 1, 1>, scalar_prefetch = 0 : i64, scratch_operands = 0 : i64, tpu.core_type = #tpu.core_type<tc>, window_params = [{transform_indices = @transform_0, window_bounds = array<i64: 8, 128>}, {transform_indices = @transform_1, window_bounds = array<i64: 8, 128>}]} {
    %c0 = arith.constant 0 : index
    %c0_0 = arith.constant 0 : index
    %0 = vector.load %arg2[%c0, %c0_0] : memref<8x128xf32, #tpu.memory_space<vmem>>, vector<8x128xf32>
    %c0_1 = arith.constant 0 : index
    %c0_2 = arith.constant 0 : index
    %1 = vector.load %arg3[%c0_1, %c0_2] : memref<8x128xf32, #tpu.memory_space<vmem>>, vector<8x128xf32>
    tpu.vector_store %arg3[%c0_1, %c0_2], %0 {strides = array<i32>} : memref<8x128xf32, #tpu.memory_space<vmem>>, vector<8x128xf32>,
    return
  }
  func.func @transform_0(%arg0: i32, %arg1: i32) -> (i32, i32) {
    %c0_i32 = arith.constant 0 : i32
    return %arg0, %arg1 : i32, i32
  }
  func.func @transform_1(%arg0: i32, %arg1: i32) -> (i32, i32) {
    %c0_i32 = arith.constant 0 : i32
    return %arg0, %arg1 : i32, i32
  }
}

</mosaic_0001>

<bundles_post_ra>
// kernel: tpu_custom_call.1
= control target key start
LH: loop header
LB: loop body
LE: loop exit
PB: predicated region body
PF: predicated region fallthrough
CT: control target
= control target key end

     0   :  { %6 = vsyncpa [#allocation3], 0  ;;  %s102_s0 = inlined_call_operand.hbm [shape: f32[8,16], index: 0, kind: input, shape index: {}]   ;;  %s103_s1 = inlined_call_operand.hbm [shape: f32[8,13], index: 1, kind: output, shape index: {}]  }
   0x1   :  { %7 = vsyncpa [#allocation4], 0  ;;  %s84_s6 = smov [#allocation2]  }
   0x2   :  { %s14_s7 = sshll.u32 %s84_s6, 4  ;;  %s15_s7 = int_to_ptr.vmem [resolvable:$true] %s14_s7 }
   0x3   :  { %s48_s8 = scalar_lea.vmem %s15_s7, 128  ;;  %p53_p1 = scmp.lt.s32.totalorder %s15_s7, %s15_s7 }
   0x4   :  { %p49_p0 = scmp.ne.s32.totalorder %s15_s7, %s48_s8  ;;  %p54_p2 = scmp.lt.s32.totalorder %s48_s8, %s48_s8 }
   0x6   :  { %p55_p3 = por %p54_p2, %p53_p1 }
   0x8   :  { %p56_p4 = pnand %p55_p3, %p49_p0 }
   0xa   :  { %59 = shalt.err (!%p56_p4)
}
   0xb   :  { %17 = dma.hbm_to_vmem [thread:$0]  %s102_s0, 128, %s15_s7, [#allocation3]  }
   0xc   :  { %80 = dma.done.wait [#allocation3], 128  }
   0xd   :  { %81 = vsyncadd [#allocation3], 4294967168  ;;  %s85_s11 = smov [#allocation5]   ;;  %v21_v0 = vld [vmem:[#allocation2] sm:$0xff] }
   0xe   :  { %s29_s12 = sshll.u32 %s85_s11, 4  ;;  %22 = vst [vmem:[#allocation5] sm:$0xff] %v21_v0  ;;  %s30_s12 = int_to_ptr.vmem [resolvable:$true] %s29_s12 }
   0xf   :  { %s60_s13 = scalar_lea.vmem %s30_s12, 128  ;;  %p65_p6 = scmp.lt.s32.totalorder %s30_s12, %s30_s12 }
  0x10   :  { %p61_p5 = scmp.ne.s32.totalorder %s30_s12, %s60_s13  ;;  %p66_p7 = scmp.lt.s32.totalorder %s60_s13, %s60_s13 }
  0x12   :  { %p67_p8 = por %p66_p7, %p65_p6 }
  0x14   :  { %p68_p9 = pnand %p67_p8, %p61_p5 }
  0x16   :  { %71 = shalt.err (!%p68_p9)
}
  0x17   :  { %32 = dma.vmem_to_hbm [thread:$0]  %s30_s12, 128, %s103_s1, [#allocation4]  }
  0x18   :  { %82 = dma.done.wait [#allocation4], 128  }
  0x19   :  { %83 = vsyncadd [#allocation4], 4294967168 }
  0x1a   :  { %36 = vsyncpa [#allocation3], 1 }
  0x1b   :  { %37 = vsyncpa [#allocation4], 1 }

</bundles_post_ra>
